<compile_context>
chip_gen: v7x
topology: tpu7x:2x2x1
jax: 0.10.0
libtpu: 0.0.40
codegen_flags: <defaults>
</compile_context>

<pallas_src>
import functools

import numpy as np
import jax
import jax.numpy as jnp
from jax.experimental import pallas as pl
from jax.experimental.pallas import tpu as pltpu

PACK = 16  # bf16 sublane pack: pad every channel dim to a multiple of 16


def _round_up(x, m):
    return ((x + m - 1) // m) * m


# -----------------------------------------------------------------------------
# Fused per-batch-element kernel (one grid step = one batch element)
# -----------------------------------------------------------------------------
def resnet1d_fused_kernel(x_ref, w_ref, s_ref, o_ref, stage_ref,
                          *, plan, C0, pad, Lp):
    """Whole ResNet1d forward for one batch element.

    x_ref     : (1, C0, Lp) f32   input, lane-padded to Lp (multiple of 128)
    w_ref     : (Wrows, Cw) bf16  all folded conv weights, per-tap row blocks
    s_ref     : (Srows, Lp) f32   all folded bias+BN shifts, lane-masked
    o_ref     : (1, Dp, Lp) f32   fc-head (1x1 conv) output
    stage_ref : (Cmax, Lp+2*pad) bf16 VMEM staging buffer providing the halo
    """
    f32 = jnp.float32
    cmax = stage_ref.shape[0]

    # Zero ONLY the halo columns (not the whole buffer).  Done every grid step
    # (2 tiny column stores) so that each TensorCore's private scratch is
    # initialised when the "parallel" batch axis is sharded across cores.
    if pad > 0:
        stage_ref[:, 0:pad] = jnp.zeros((cmax, pad), stage_ref.dtype)
        stage_ref[:, pad + Lp:pad + Lp + pad] = jnp.zeros((cmax, pad),
                                                          stage_ref.dtype)

    def conv(cin_p, cout_p, K, w_off, s_off, relu):
        """K-tap stride-1 'same' conv on the activation resident in
        stage_ref[0:cin_p, pad:pad+Lp]: K accumulated MXU dots on shifted
        stage views (no im2col buffer), f32 accumulation initialised with the
        folded bias+BN shift, optional fused ReLU."""
        acc = s_ref[s_off:s_off + cout_p, :]                    # f32 (cout_p, Lp)
        half = (K - 1) // 2
        for k in range(K):                                      # static unroll
            start = pad + k - half
            wk = w_ref[w_off + k * cout_p:w_off + (k + 1) * cout_p, 0:cin_p]
            xk = stage_ref[0:cin_p, start:start + Lp]
            acc = acc + jnp.dot(wk, xk, preferred_element_type=f32)
        return jnp.maximum(acc, 0.0) if relu else acc

    # ---- stage the input (channel zero-padding happens here, in-kernel) ----
    cin0 = plan["blocks"][0]["cin_p"]
    cur = x_ref[0].astype(f32)                                  # (C0, Lp)
    if cin0 > C0:
        cur = jnp.concatenate(
            [cur, jnp.zeros((cin0 - C0, Lp), f32)], axis=0)     # (cin0, Lp)
    stage_ref[0:cin0, pad:pad + Lp] = cur.astype(stage_ref.dtype)

    # ---- residual blocks: conv1+BN+ReLU, conv2+BN, 1x1 down+BN, add+ReLU ----
    for blk in plan["blocks"]:
        cin_p, cout_p, K = blk["cin_p"], blk["cout_p"], blk["K"]
        h = conv(cin_p, cout_p, K, blk["w1"], blk["s1"], relu=True)
        if blk["down"] is not None:
            # Reads the staged x BEFORE it is overwritten below.
            identity = conv(cin_p, cout_p, 1, blk["down"][0], blk["down"][1],
                            relu=False)
        else:
            identity = cur                                      # f32, full precision
        stage_ref[0:cout_p, pad:pad + Lp] = h.astype(stage_ref.dtype)
        h = conv(cout_p, cout_p, K, blk["w2"], blk["s2"], relu=False)
        cur = jnp.maximum(h + identity, 0.0)                    # f32 epilogue
        stage_ref[0:cout_p, pad:pad + Lp] = cur.astype(stage_ref.dtype)

    # ---- fc head (1x1 conv over channels) ----
    fc = plan["fc"]
    out = conv(fc["cin_p"], fc["cout_p"], 1, fc["w"], fc["s"], relu=False)
    o_ref[0] = out.astype(o_ref.dtype)


# -----------------------------------------------------------------------------
# One-time parameter preparation (eval mode): BN folding, channel padding,
# per-tap weight layout, and consolidation into two flat slabs.
# -----------------------------------------------------------------------------
def fold_bn(gamma, beta, mean, var, eps=1e-5):
    scale = gamma / jnp.sqrt(var + eps)
    shift = beta - mean * scale
    return scale, shift


def prepare_fused_params(params, channels, d_output, kernel_size=3):
    """Returns (w_slab bf16 (Wrows, cin_max), shift_col f32 (Srows, 1), plan)."""
    cpad = [_round_up(c, PACK) for c in channels]
    dpad = _round_up(d_output, PACK)
    cin_max = max(cpad)

    w_rows, s_rows = [], []
    state = {"w": 0, "s": 0}

    def add_conv(w, b, scale, shift, cin, cout, cin_p, cout_p):
        w = np.asarray(w, np.float32)
        scale = np.asarray(scale, np.float32)
        K = int(w.shape[-1])
        wf = w * scale[:, None, None]                       # fold BN scale
        for k in range(K):                                  # per-tap row block
            wk = np.zeros((cout_p, cin_max), np.float32)
            wk[:cout, :cin] = wf[:, :, k]
            w_rows.append(wk)
        sh = np.zeros((cout_p, 1), np.float32)
        sh[:cout, 0] = (np.asarray(b, np.float32) * scale
                        + np.asarray(shift, np.float32))
        s_rows.append(sh)
        off = (state["w"], state["s"])
        state["w"] += K * cout_p
        state["s"] += cout_p
        return off

    blocks = []
    for bi, blk in enumerate(params["blocks"]):
        cin, cout = channels[bi], channels[bi + 1]
        cin_p, cout_p = cpad[bi], cpad[bi + 1]
        w1 = add_conv(blk["w1"], blk["b1"], blk["s1"], blk["sh1"],
                      cin, cout, cin_p, cout_p)
        w2 = add_conv(blk["w2"], blk["b2"], blk["s2"], blk["sh2"],
                      cout, cout, cout_p, cout_p)
        down = None
        if blk["down"] is not None:
            down = add_conv(blk["down"]["w"], np.zeros((cout,), np.float32),
                            blk["down"]["s"], blk["down"]["sh"],
                            cin, cout, cin_p, cout_p)
        blocks.append(dict(cin_p=cin_p, cout_p=cout_p, K=kernel_size,
                           w1=w1[0], s1=w1[1], w2=w2[0], s2=w2[1], down=down))

    fc = add_conv(params["fc_w"], params["fc_b"],
                  np.ones((d_output,), np.float32),
                  np.zeros((d_output,), np.float32),
                  channels[-1], d_output, cpad[-1], dpad)

    plan = dict(blocks=blocks,
                fc=dict(cin_p=cpad[-1], cout_p=dpad, w=fc[0], s=fc[1]),
                cmax=max(cpad))
    w_slab = jnp.asarray(np.concatenate(w_rows, axis=0), jnp.bfloat16)
    shift_col = jnp.asarray(np.concatenate(s_rows, axis=0), jnp.float32)
    return w_slab, shift_col, plan


# -----------------------------------------------------------------------------
# Forward wrapper (layout plumbing only)
# -----------------------------------------------------------------------------
def resnet1d_forward(x, w_slab, shift_col, *, plan, channels, d_output,
                     kernel_size=3):
    """ResNet1d.forward for the module defaults (single_output=False,
    transpose=False, no_input_channels=False), eval-mode BatchNorm."""
    assert kernel_size % 2 == 1, "even/asymmetric 'same' padding not implemented"
    pad = (kernel_size - 1) // 2
    sz0 = x.shape
    L = sz0[-1]
    C0 = channels[0]
    B = int(np.prod(sz0[:-2])) if len(sz0) > 2 else 1

    Lp = _round_up(L, 128)                      # lane-dense tile width
    dpad = plan["fc"]["cout_p"]
    cmax = plan["cmax"]

    x3 = x.reshape(B, C0, L).astype(jnp.float32)
    if Lp != L:
        # Lane pad only (no channel pad / transpose in the wrapper).  Padded
        # columns stay zero in-kernel because the shifts are lane-masked below.
        x3 = jnp.pad(x3, ((0, 0), (0, 0), (0, Lp - L)))

    valid = (jnp.arange(Lp) < L).astype(jnp.float32)[None, :]
    shift_slab = shift_col * valid              # (Srows, Lp), zero in padded lanes

    kernel = functools.partial(resnet1d_fused_kernel,
                               plan=plan, C0=C0, pad=pad, Lp=Lp)

    out = pl.pallas_call(
        kernel,
        out_shape=jax.ShapeDtypeStruct((B, dpad, Lp), jnp.float32),
        grid=(B,),
        in_specs=[
            pl.BlockSpec((1, C0, Lp), lambda b: (b, 0, 0)),      # per-batch tile
            pl.BlockSpec(w_slab.shape, lambda b: (0, 0)),        # resident weights
            pl.BlockSpec(shift_slab.shape, lambda b: (0, 0)),    # resident shifts
        ],
        out_specs=pl.BlockSpec((1, dpad, Lp), lambda b: (b, 0, 0)),
        scratch_shapes=[pltpu.VMEM((cmax, Lp + 2 * pad), jnp.bfloat16)],
        compiler_params=pltpu.CompilerParams(
            dimension_semantics=("parallel",),      # megacore sharding on v7x
            vmem_limit_bytes=48 * 1024 * 1024,      # < v7x 64 MiB physical VMEM
        ),
    )(x3, w_slab, shift_slab)

    out = out[:, :d_output, :L]                 # drop channel / lane padding
    return out.reshape(sz0[:-2] + (d_output, L))


# -----------------------------------------------------------------------------
# Deterministic synthetic parameters
# -----------------------------------------------------------------------------
def init_params(key, channels, d_output, kernel_size=3):
    keys = iter(jax.random.split(key, 64))

    def rnd(shape, s=0.1):
        return (s * jax.random.normal(next(keys), shape)).astype(jnp.float32)

    def bn_params(c):
        gamma = 1.0 + rnd((c,), 0.05)
        beta = rnd((c,), 0.05)
        mean = rnd((c,), 0.05)
        var = 1.0 + jnp.abs(rnd((c,), 0.05))
        return fold_bn(gamma, beta, mean, var)

    blocks = []
    for cin, cout in zip(channels[:-1], channels[1:]):
        blk = {
            "w1": rnd((cout, cin, kernel_size)), "b1": rnd((cout,)),
            "w2": rnd((cout, cout, kernel_size)), "b2": rnd((cout,)),
        }
        blk["s1"], blk["sh1"] = bn_params(cout)
        blk["s2"], blk["sh2"] = bn_params(cout)
        if cin != cout:                         # stride is always 1 ('same' pad)
            dw = rnd((cout, cin, 1))
            ds, dsh = bn_params(cout)
            blk["down"] = {"w": dw, "s": ds, "sh": dsh}
        else:
            blk["down"] = None
        blocks.append(blk)

    fc_w = rnd((d_output, channels[-1], 1))
    fc_b = rnd((d_output,))
    return {"blocks": blocks, "fc_w": fc_w, "fc_b": fc_b}


# -----------------------------------------------------------------------------
# Pure-JAX reference (f32) for correctness check
# -----------------------------------------------------------------------------
def ref_conv1d(x, w, b, pad):
    out = jax.lax.conv_general_dilated(
        x, w, window_strides=(1,), padding=[(pad, pad)],
        dimension_numbers=("NCH", "OIH", "NCH"))
    return out + b[None, :, None]


def ref_forward(x, params, channels, kernel_size=3):
    pad = (kernel_size - 1) // 2
    sz0 = x.shape
    L = sz0[-1]
    B = int(np.prod(sz0[:-2])) if len(sz0) > 2 else 1
    x = x.reshape(B, channels[0], L)
    for blk in params["blocks"]:
        h = ref_conv1d(x, blk["w1"], blk["b1"], pad)
        h = jnp.maximum(h * blk["s1"][None, :, None] + blk["sh1"][None, :, None], 0.0)
        h = ref_conv1d(h, blk["w2"], blk["b2"], pad)
        h = h * blk["s2"][None, :, None] + blk["sh2"][None, :, None]
        if blk["down"] is not None:
            cout = blk["w1"].shape[0]
            idn = ref_conv1d(x, blk["down"]["w"], jnp.zeros((cout,), jnp.float32), 0)
            idn = (idn * blk["down"]["s"][None, :, None]
                   + blk["down"]["sh"][None, :, None])
        else:
            idn = x
        x = jnp.maximum(h + idn, 0.0)
    out = ref_conv1d(x, params["fc_w"], params["fc_b"], 0)
    return out.reshape(sz0[:-2] + out.shape[-2:])


# -----------------------------------------------------------------------------
if __name__ == "__main__":
    channels = [4, 8, 8]        # ResNet1d(channels=[4, 8, 8], d_output=5)
    d_output = 5
    B, L = 2, 16

    key = jax.random.PRNGKey(0)
    kx, kp = jax.random.split(key)
    x = jax.random.normal(kx, (B, channels[0], L), dtype=jnp.float32)
    params = init_params(kp, channels, d_output)

    # One-time eval-mode folding: bias+BN into weights, per-tap layout,
    # channel padding, slab consolidation.
    w_slab, shift_col, plan = prepare_fused_params(params, channels, d_output,
                                                   kernel_size=3)

    fwd = jax.jit(functools.partial(resnet1d_forward, plan=plan,
                                    channels=channels, d_output=d_output,
                                    kernel_size=3))
    out = jax.block_until_ready(fwd(x, w_slab, shift_col))
    assert out.shape == (B, d_output, L), out.shape

    ref = jax.block_until_ready(ref_forward(x, params, channels, kernel_size=3))
    # bf16 MXU operands (f32 accumulation) -> loosened tolerance vs f32 reference.
    np.testing.assert_allclose(np.asarray(out), np.asarray(ref),
                               rtol=5e-2, atol=5e-2)

    print("KERNEL_OK")
</pallas_src>

<mosaic_0001>
module attributes {stable_mosaic.version = 11 : i64} {
  func.func @resnet1d_fused_kernel(%arg0: i32, %arg1: memref<1x4x128xf32, #tpu.memory_space<vmem>>, %arg2: memref<224x16xbf16, #tpu.memory_space<vmem>>, %arg3: memref<96x128xf32, #tpu.memory_space<vmem>>, %arg4: memref<1x16x128xf32, #tpu.memory_space<vmem>>, %arg5: memref<16x130xbf16, #tpu.memory_space<vmem>>) attributes {dimension_semantics = [#tpu.dimension_semantics<parallel>], iteration_bounds = array<i64: 2>, scalar_prefetch = 0 : i64, scratch_operands = 1 : i64, tpu.core_type = #tpu.core_type<tc>, window_params = [{transform_indices = @transform_0, window_bounds = array<i64: 1, 4, 128>}, {pipeline_mode = #tpu.pipeline_mode<synchronous>, transform_indices = @transform_1, window_bounds = array<i64: 224, 16>}, {pipeline_mode = #tpu.pipeline_mode<synchronous>, transform_indices = @transform_2, window_bounds = array<i64: 96, 128>}, {transform_indices = @transform_3, window_bounds = array<i64: 1, 16, 128>}]} {
    %cst = arith.constant 0.000000e+00 : bf16
    %0 = vector.broadcast %cst : bf16 to vector<16x1xbf16>
    %c0 = arith.constant 0 : index
    %c0_0 = arith.constant 0 : index
    %1 = vector.load %arg5[%c0, %c0_0] : memref<16x130xbf16, #tpu.memory_space<vmem>>, vector<16x1xbf16>
    tpu.vector_store %arg5[%c0, %c0_0], %0 {strides = array<i32>} : memref<16x130xbf16, #tpu.memory_space<vmem>>, vector<16x1xbf16>,
    %cst_1 = arith.constant 0.000000e+00 : bf16
    %2 = vector.broadcast %cst_1 : bf16 to vector<16x1xbf16>
    %c0_2 = arith.constant 0 : index
    %c129 = arith.constant 129 : index
    %3 = vector.load %arg5[%c0_2, %c129] : memref<16x130xbf16, #tpu.memory_space<vmem>>, vector<16x1xbf16>
    tpu.vector_store %arg5[%c0_2, %c129], %2 {strides = array<i32>} : memref<16x130xbf16, #tpu.memory_space<vmem>>, vector<16x1xbf16>,
    %c0_3 = arith.constant 0 : index
    %c0_4 = arith.constant 0 : index
    %c0_5 = arith.constant 0 : index
    %4 = vector.load %arg1[%c0_3, %c0_4, %c0_5] : memref<1x4x128xf32, #tpu.memory_space<vmem>>, vector<1x4x128xf32>
    %5 = vector.shape_cast %4 : vector<1x4x128xf32> to vector<4x128xf32>
    %cst_6 = arith.constant 0.000000e+00 : f32
    %6 = vector.broadcast %cst_6 : f32 to vector<12x128xf32>
    %7 = tpu.concatenate %5, %6 in 0 : vector<4x128xf32>, vector<12x128xf32> -> vector<16x128xf32>
    %8 = arith.truncf %7 : vector<16x128xf32> to vector<16x128xbf16>
    %c0_7 = arith.constant 0 : index
    %c1 = arith.constant 1 : index
    %9 = vector.load %arg5[%c0_7, %c1] : memref<16x130xbf16, #tpu.memory_space<vmem>>, vector<16x128xbf16>
    tpu.vector_store %arg5[%c0_7, %c1], %8 {strides = array<i32>} : memref<16x130xbf16, #tpu.memory_space<vmem>>, vector<16x128xbf16>,
    %c0_8 = arith.constant 0 : index
    %c0_9 = arith.constant 0 : index
    %10 = vector.load %arg3[%c0_8, %c0_9] : memref<96x128xf32, #tpu.memory_space<vmem>>, vector<16x128xf32>
    %c0_10 = arith.constant 0 : index
    %c0_11 = arith.constant 0 : index
    %11 = vector.load %arg2[%c0_10, %c0_11] : memref<224x16xbf16, #tpu.memory_space<vmem>>, vector<16x16xbf16>
    %c0_12 = arith.constant 0 : index
    %c0_13 = arith.constant 0 : index
    %12 = vector.load %arg5[%c0_12, %c0_13] : memref<16x130xbf16, #tpu.memory_space<vmem>>, vector<16x128xbf16>
    %cst_14 = arith.constant dense<0.000000e+00> : vector<16x128xf32>
    %13 = tpu.matmul %11, %12, %cst_14 {dimension_numbers = #tpu.dot_dimension_numbers<[1], [0], [0], [1], [0, 0, 1, 1], [], []>} : vector<16x16xbf16>, vector<16x128xbf16>, vector<16x128xf32> -> vector<16x128xf32>
    %14 = arith.addf %10, %13 : vector<16x128xf32>
    %c16 = arith.constant 16 : index
    %c0_15 = arith.constant 0 : index
    %15 = vector.load %arg2[%c16, %c0_15] : memref<224x16xbf16, #tpu.memory_space<vmem>>, vector<16x16xbf16>
    %c0_16 = arith.constant 0 : index
    %c1_17 = arith.constant 1 : index
    %16 = vector.load %arg5[%c0_16, %c1_17] : memref<16x130xbf16, #tpu.memory_space<vmem>>, vector<16x128xbf16>
    %cst_18 = arith.constant dense<0.000000e+00> : vector<16x128xf32>
    %17 = tpu.matmul %15, %16, %cst_18 {dimension_numbers = #tpu.dot_dimension_numbers<[1], [0], [0], [1], [0, 0, 1, 1], [], []>} : vector<16x16xbf16>, vector<16x128xbf16>, vector<16x128xf32> -> vector<16x128xf32>
    %18 = arith.addf %14, %17 : vector<16x128xf32>
    %c32 = arith.constant 32 : index
    %c0_19 = arith.constant 0 : index
    %19 = vector.load %arg2[%c32, %c0_19] : memref<224x16xbf16, #tpu.memory_space<vmem>>, vector<16x16xbf16>
    %c0_20 = arith.constant 0 : index
    %c2 = arith.constant 2 : index
    %20 = vector.load %arg5[%c0_20, %c2] : memref<16x130xbf16, #tpu.memory_space<vmem>>, vector<16x128xbf16>
    %cst_21 = arith.constant dense<0.000000e+00> : vector<16x128xf32>
    %21 = tpu.matmul %19, %20, %cst_21 {dimension_numbers = #tpu.dot_dimension_numbers<[1], [0], [0], [1], [0, 0, 1, 1], [], []>} : vector<16x16xbf16>, vector<16x128xbf16>, vector<16x128xf32> -> vector<16x128xf32>
    %22 = arith.addf %18, %21 : vector<16x128xf32>
    %cst_22 = arith.constant 0.000000e+00 : f32
    %23 = vector.broadcast %cst_22 : f32 to vector<16x128xf32>
    %24 = arith.maximumf %22, %23 : vector<16x128xf32>
    %c32_23 = arith.constant 32 : index
    %c0_24 = arith.constant 0 : index
    %25 = vector.load %arg3[%c32_23, %c0_24] : memref<96x128xf32, #tpu.memory_space<vmem>>, vector<16x128xf32>
    %c96 = arith.constant 96 : index
    %c0_25 = arith.constant 0 : index
    %26 = vector.load %arg2[%c96, %c0_25] : memref<224x16xbf16, #tpu.memory_space<vmem>>, vector<16x16xbf16>
    %c0_26 = arith.constant 0 : index
    %c1_27 = arith.constant 1 : index
    %27 = vector.load %arg5[%c0_26, %c1_27] : memref<16x130xbf16, #tpu.memory_space<vmem>>, vector<16x128xbf16>
    %cst_28 = arith.constant dense<0.000000e+00> : vector<16x128xf32>
    %28 = tpu.matmul %26, %27, %cst_28 {dimension_numbers = #tpu.dot_dimension_numbers<[1], [0], [0], [1], [0, 0, 1, 1], [], []>} : vector<16x16xbf16>, vector<16x128xbf16>, vector<16x128xf32> -> vector<16x128xf32>
    %29 = arith.addf %25, %28 : vector<16x128xf32>
    %30 = arith.truncf %24 : vector<16x128xf32> to vector<16x128xbf16>
    %c0_29 = arith.constant 0 : index
    %c1_30 = arith.constant 1 : index
    %31 = vector.load %arg5[%c0_29, %c1_30] : memref<16x130xbf16, #tpu.memory_space<vmem>>, vector<16x128xbf16>
    tpu.vector_store %arg5[%c0_29, %c1_30], %30 {strides = array<i32>} : memref<16x130xbf16, #tpu.memory_space<vmem>>, vector<16x128xbf16>,
    %c16_31 = arith.constant 16 : index
    %c0_32 = arith.constant 0 : index
    %32 = vector.load %arg3[%c16_31, %c0_32] : memref<96x128xf32, #tpu.memory_space<vmem>>, vector<16x128xf32>
    %c48 = arith.constant 48 : index
    %c0_33 = arith.constant 0 : index
    %33 = vector.load %arg2[%c48, %c0_33] : memref<224x16xbf16, #tpu.memory_space<vmem>>, vector<16x16xbf16>
    %c0_34 = arith.constant 0 : index
    %c0_35 = arith.constant 0 : index
    %34 = vector.load %arg5[%c0_34, %c0_35] : memref<16x130xbf16, #tpu.memory_space<vmem>>, vector<16x128xbf16>
    %cst_36 = arith.constant dense<0.000000e+00> : vector<16x128xf32>
    %35 = tpu.matmul %33, %34, %cst_36 {dimension_numbers = #tpu.dot_dimension_numbers<[1], [0], [0], [1], [0, 0, 1, 1], [], []>} : vector<16x16xbf16>, vector<16x128xbf16>, vector<16x128xf32> -> vector<16x128xf32>
    %36 = arith.addf %32, %35 : vector<16x128xf32>
    %c64 = arith.constant 64 : index
    %c0_37 = arith.constant 0 : index
    %37 = vector.load %arg2[%c64, %c0_37] : memref<224x16xbf16, #tpu.memory_space<vmem>>, vector<16x16xbf16>
    %c0_38 = arith.constant 0 : index
    %c1_39 = arith.constant 1 : index
    %38 = vector.load %arg5[%c0_38, %c1_39] : memref<16x130xbf16, #tpu.memory_space<vmem>>, vector<16x128xbf16>
    %cst_40 = arith.constant dense<0.000000e+00> : vector<16x128xf32>
    %39 = tpu.matmul %37, %38, %cst_40 {dimension_numbers = #tpu.dot_dimension_numbers<[1], [0], [0], [1], [0, 0, 1, 1], [], []>} : vector<16x16xbf16>, vector<16x128xbf16>, vector<16x128xf32> -> vector<16x128xf32>
    %40 = arith.addf %36, %39 : vector<16x128xf32>
    %c80 = arith.constant 80 : index
    %c0_41 = arith.constant 0 : index
    %41 = vector.load %arg2[%c80, %c0_41] : memref<224x16xbf16, #tpu.memory_space<vmem>>, vector<16x16xbf16>
    %c0_42 = arith.constant 0 : index
    %c2_43 = arith.constant 2 : index
    %42 = vector.load %arg5[%c0_42, %c2_43] : memref<16x130xbf16, #tpu.memory_space<vmem>>, vector<16x128xbf16>
    %cst_44 = arith.constant dense<0.000000e+00> : vector<16x128xf32>
    %43 = tpu.matmul %41, %42, %cst_44 {dimension_numbers = #tpu.dot_dimension_numbers<[1], [0], [0], [1], [0, 0, 1, 1], [], []>} : vector<16x16xbf16>, vector<16x128xbf16>, vector<16x128xf32> -> vector<16x128xf32>
    %44 = arith.addf %40, %43 : vector<16x128xf32>
    %45 = arith.addf %44, %29 : vector<16x128xf32>
    %cst_45 = arith.constant 0.000000e+00 : f32
    %46 = vector.broadcast %cst_45 : f32 to vector<16x128xf32>
    %47 = arith.maximumf %45, %46 : vector<16x128xf32>
    %48 = arith.truncf %47 : vector<16x128xf32> to vector<16x128xbf16>
    %c0_46 = arith.constant 0 : index
    %c1_47 = arith.constant 1 : index
    %49 = vector.load %arg5[%c0_46, %c1_47] : memref<16x130xbf16, #tpu.memory_space<vmem>>, vector<16x128xbf16>
    tpu.vector_store %arg5[%c0_46, %c1_47], %48 {strides = array<i32>} : memref<16x130xbf16, #tpu.memory_space<vmem>>, vector<16x128xbf16>,
    %c48_48 = arith.constant 48 : index
    %c0_49 = arith.constant 0 : index
    %50 = vector.load %arg3[%c48_48, %c0_49] : memref<96x128xf32, #tpu.memory_space<vmem>>, vector<16x128xf32>
    %c112 = arith.constant 112 : index
    %c0_50 = arith.constant 0 : index
    %51 = vector.load %arg2[%c112, %c0_50] : memref<224x16xbf16, #tpu.memory_space<vmem>>, vector<16x16xbf16>
    %c0_51 = arith.constant 0 : index
    %c0_52 = arith.constant 0 : index
    %52 = vector.load %arg5[%c0_51, %c0_52] : memref<16x130xbf16, #tpu.memory_space<vmem>>, vector<16x128xbf16>
    %cst_53 = arith.constant dense<0.000000e+00> : vector<16x128xf32>
    %53 = tpu.matmul %51, %52, %cst_53 {dimension_numbers = #tpu.dot_dimension_numbers<[1], [0], [0], [1], [0, 0, 1, 1], [], []>} : vector<16x16xbf16>, vector<16x128xbf16>, vector<16x128xf32> -> vector<16x128xf32>
    %54 = arith.addf %50, %53 : vector<16x128xf32>
    %c128 = arith.constant 128 : index
    %c0_54 = arith.constant 0 : index
    %55 = vector.load %arg2[%c128, %c0_54] : memref<224x16xbf16, #tpu.memory_space<vmem>>, vector<16x16xbf16>
    %c0_55 = arith.constant 0 : index
    %c1_56 = arith.constant 1 : index
    %56 = vector.load %arg5[%c0_55, %c1_56] : memref<16x130xbf16, #tpu.memory_space<vmem>>, vector<16x128xbf16>
    %cst_57 = arith.constant dense<0.000000e+00> : vector<16x128xf32>
    %57 = tpu.matmul %55, %56, %cst_57 {dimension_numbers = #tpu.dot_dimension_numbers<[1], [0], [0], [1], [0, 0, 1, 1], [], []>} : vector<16x16xbf16>, vector<16x128xbf16>, vector<16x128xf32> -> vector<16x128xf32>
    %58 = arith.addf %54, %57 : vector<16x128xf32>
    %c144 = arith.constant 144 : index
    %c0_58 = arith.constant 0 : index
    %59 = vector.load %arg2[%c144, %c0_58] : memref<224x16xbf16, #tpu.memory_space<vmem>>, vector<16x16xbf16>
    %c0_59 = arith.constant 0 : index
    %c2_60 = arith.constant 2 : index
    %60 = vector.load %arg5[%c0_59, %c2_60] : memref<16x130xbf16, #tpu.memory_space<vmem>>, vector<16x128xbf16>
    %cst_61 = arith.constant dense<0.000000e+00> : vector<16x128xf32>
    %61 = tpu.matmul %59, %60, %cst_61 {dimension_numbers = #tpu.dot_dimension_numbers<[1], [0], [0], [1], [0, 0, 1, 1], [], []>} : vector<16x16xbf16>, vector<16x128xbf16>, vector<16x128xf32> -> vector<16x128xf32>
    %62 = arith.addf %58, %61 : vector<16x128xf32>
    %cst_62 = arith.constant 0.000000e+00 : f32
    %63 = vector.broadcast %cst_62 : f32 to vector<16x128xf32>
    %64 = arith.maximumf %62, %63 : vector<16x128xf32>
    %65 = arith.truncf %64 : vector<16x128xf32> to vector<16x128xbf16>
    %c0_63 = arith.constant 0 : index
    %c1_64 = arith.constant 1 : index
    %66 = vector.load %arg5[%c0_63, %c1_64] : memref<16x130xbf16, #tpu.memory_space<vmem>>, vector<16x128xbf16>
    tpu.vector_store %arg5[%c0_63, %c1_64], %65 {strides = array<i32>} : memref<16x130xbf16, #tpu.memory_space<vmem>>, vector<16x128xbf16>,
    %c64_65 = arith.constant 64 : index
    %c0_66 = arith.constant 0 : index
    %67 = vector.load %arg3[%c64_65, %c0_66] : memref<96x128xf32, #tpu.memory_space<vmem>>, vector<16x128xf32>
    %c160 = arith.constant 160 : index
    %c0_67 = arith.constant 0 : index
    %68 = vector.load %arg2[%c160, %c0_67] : memref<224x16xbf16, #tpu.memory_space<vmem>>, vector<16x16xbf16>
    %c0_68 = arith.constant 0 : index
    %c0_69 = arith.constant 0 : index
    %69 = vector.load %arg5[%c0_68, %c0_69] : memref<16x130xbf16, #tpu.memory_space<vmem>>, vector<16x128xbf16>
    %cst_70 = arith.constant dense<0.000000e+00> : vector<16x128xf32>
    %70 = tpu.matmul %68, %69, %cst_70 {dimension_numbers = #tpu.dot_dimension_numbers<[1], [0], [0], [1], [0, 0, 1, 1], [], []>} : vector<16x16xbf16>, vector<16x128xbf16>, vector<16x128xf32> -> vector<16x128xf32>
    %71 = arith.addf %67, %70 : vector<16x128xf32>
    %c176 = arith.constant 176 : index
    %c0_71 = arith.constant 0 : index
    %72 = vector.load %arg2[%c176, %c0_71] : memref<224x16xbf16, #tpu.memory_space<vmem>>, vector<16x16xbf16>
    %c0_72 = arith.constant 0 : index
    %c1_73 = arith.constant 1 : index
    %73 = vector.load %arg5[%c0_72, %c1_73] : memref<16x130xbf16, #tpu.memory_space<vmem>>, vector<16x128xbf16>
    %cst_74 = arith.constant dense<0.000000e+00> : vector<16x128xf32>
    %74 = tpu.matmul %72, %73, %cst_74 {dimension_numbers = #tpu.dot_dimension_numbers<[1], [0], [0], [1], [0, 0, 1, 1], [], []>} : vector<16x16xbf16>, vector<16x128xbf16>, vector<16x128xf32> -> vector<16x128xf32>
    %75 = arith.addf %71, %74 : vector<16x128xf32>
    %c192 = arith.constant 192 : index
    %c0_75 = arith.constant 0 : index
    %76 = vector.load %arg2[%c192, %c0_75] : memref<224x16xbf16, #tpu.memory_space<vmem>>, vector<16x16xbf16>
    %c0_76 = arith.constant 0 : index
    %c2_77 = arith.constant 2 : index
    %77 = vector.load %arg5[%c0_76, %c2_77] : memref<16x130xbf16, #tpu.memory_space<vmem>>, vector<16x128xbf16>
    %cst_78 = arith.constant dense<0.000000e+00> : vector<16x128xf32>
    %78 = tpu.matmul %76, %77, %cst_78 {dimension_numbers = #tpu.dot_dimension_numbers<[1], [0], [0], [1], [0, 0, 1, 1], [], []>} : vector<16x16xbf16>, vector<16x128xbf16>, vector<16x128xf32> -> vector<16x128xf32>
    %79 = arith.addf %75, %78 : vector<16x128xf32>
    %80 = arith.addf %79, %47 : vector<16x128xf32>
    %cst_79 = arith.constant 0.000000e+00 : f32
    %81 = vector.broadcast %cst_79 : f32 to vector<16x128xf32>
    %82 = arith.maximumf %80, %81 : vector<16x128xf32>
    %83 = arith.truncf %82 : vector<16x128xf32> to vector<16x128xbf16>
    %c0_80 = arith.constant 0 : index
    %c1_81 = arith.constant 1 : index
    %84 = vector.load %arg5[%c0_80, %c1_81] : memref<16x130xbf16, #tpu.memory_space<vmem>>, vector<16x128xbf16>
    tpu.vector_store %arg5[%c0_80, %c1_81], %83 {strides = array<i32>} : memref<16x130xbf16, #tpu.memory_space<vmem>>, vector<16x128xbf16>,
    %c80_82 = arith.constant 80 : index
    %c0_83 = arith.constant 0 : index
    %85 = vector.load %arg3[%c80_82, %c0_83] : memref<96x128xf32, #tpu.memory_space<vmem>>, vector<16x128xf32>
    %c208 = arith.constant 208 : index
    %c0_84 = arith.constant 0 : index
    %86 = vector.load %arg2[%c208, %c0_84] : memref<224x16xbf16, #tpu.memory_space<vmem>>, vector<16x16xbf16>
    %c0_85 = arith.constant 0 : index
    %c1_86 = arith.constant 1 : index
    %87 = vector.load %arg5[%c0_85, %c1_86] : memref<16x130xbf16, #tpu.memory_space<vmem>>, vector<16x128xbf16>
    %cst_87 = arith.constant dense<0.000000e+00> : vector<16x128xf32>
    %88 = tpu.matmul %86, %87, %cst_87 {dimension_numbers = #tpu.dot_dimension_numbers<[1], [0], [0], [1], [0, 0, 1, 1], [], []>} : vector<16x16xbf16>, vector<16x128xbf16>, vector<16x128xf32> -> vector<16x128xf32>
    %89 = arith.addf %85, %88 : vector<16x128xf32>
    %c0_88 = arith.constant 0 : index
    %c0_89 = arith.constant 0 : index
    %c0_90 = arith.constant 0 : index
    %90 = vector.load %arg4[%c0_88, %c0_89, %c0_90] : memref<1x16x128xf32, #tpu.memory_space<vmem>>, vector<1x16x128xf32>
    %91 = vector.shape_cast %90 : vector<1x16x128xf32> to vector<16x128xf32>
    %92 = vector.shape_cast %89 : vector<16x128xf32> to vector<1x16x128xf32>
    tpu.vector_store %arg4[%c0_88, %c0_89, %c0_90], %92 {strides = array<i32>} : memref<1x16x128xf32, #tpu.memory_space<vmem>>, vector<1x16x128xf32>,
    return
  }
  func.func @transform_0(%arg0: i32) -> (i32, i32, i32) {
    %c0_i32 = arith.constant 0 : i32
    %c0_i32_0 = arith.constant 0 : i32
    %c0_i32_1 = arith.constant 0 : i32
    return %arg0, %c0_i32, %c0_i32_0 : i32, i32, i32
  }
  func.func @transform_1(%arg0: i32) -> (i32, i32) {
    %c0_i32 = arith.constant 0 : i32
    %c0_i32_0 = arith.constant 0 : i32
    %c0_i32_1 = arith.constant 0 : i32
    return %c0_i32, %c0_i32_0 : i32, i32
  }
  func.func @transform_2(%arg0: i32) -> (i32, i32) {
    %c0_i32 = arith.constant 0 : i32
    %c0_i32_0 = arith.constant 0 : i32
    %c0_i32_1 = arith.constant 0 : i32
    return %c0_i32, %c0_i32_0 : i32, i32
  }
  func.func @transform_3(%arg0: i32) -> (i32, i32, i32) {
    %c0_i32 = arith.constant 0 : i32
    %c0_i32_0 = arith.constant 0 : i32
    %c0_i32_1 = arith.constant 0 : i32
    return %arg0, %c0_i32, %c0_i32_0 : i32, i32, i32
  }
}

</mosaic_0001>

<bundles_post_ra>
// kernel: resnet1d_forward.1
= control target key start
LH: loop header
LB: loop body
LE: loop exit
PB: predicated region body
PF: predicated region fallthrough
CT: control target
= control target key end

     0   :  { %s1365_s12 = smov 0   ;;  %s1578_s0 = inlined_call_operand.vmem [shape: f32[2,4,128], index: 0, kind: input, shape index: {}]   ;;  %s1579_s1 = inlined_call_operand.vmem [shape: bf16[224,16], index: 1, kind: input, shape index: {}]   ;;  %s1580_s2 = inlined_call_operand.vmem [shape: f32[96,128], index: 2, kind: input, shape index: {}]   ;;  %s1581_s3 = inlined_call_operand.vmem [shape: f32[2,16,128], index: 3, kind: output, shape index: {}]  }
   0x1 LB: > { %s1116_s13 = sadd.s32 4294967295, %s1337_s12   ;;  %p1120_p0 = scmp.ge.s32.totalorder %s1337_s12, 1  ;;  %s1337_s12 = sphi %s1365_s12, %s13_s12  }
   0x2   : > { %p136_p1 = scmp.lt.s32.totalorder %s1337_s12, 3 }
   0x4   : > { %p137_p2 = pnand %p1120_p0, %p136_p1 }
   0x5   : > { %p159_p3 = scmp.lt.s32.totalorder (!%p137_p2), %s1116_s13, 1  ;;  %vm169_vm0 = vcmask (!%p137_p2), 7168   ;;  %v1339_v0 = vmov (!%p137_p2), 0   ;;  %vm171_vm1 = vcmask (!%p137_p2), 15368   ;;  %v1340_v1 = vmov (!%p137_p2), 0.0   ;;  %s1341_s18 = smov (!%p137_p2), 1  }
   0x6   : > { %140 = sbr.rel (%p137_p2) target bundleno = 2374 (0x946), region = 32  ;;  %170 = vst.msk [vmem:[#allocation2] sm:$0xff] (!%p137_p2), %vm169_vm0, %v1339_v0  ;;  %1183 = vmatprep.subr.bf16.mxu0 (!%p137_p2), %v1340_v1  ;;  %1201 = vmatprep.subr.bf16.mxu1 (!%p137_p2), %v1340_v1  ;;  %vm174_vm2 = vcmask (!%p137_p2), 1043456   ;;  %vm1342_vm3 = vmmov (!%p137_p2), 0   ;;  %vm181_vm4 = vcmask (!%p137_p2), 1047560   ;;  %s1343_s19 = smov (!%p137_p2), 127  }
   0x7   : > { %172 = vst.msk [vmem:[#allocation2 + $0x8] sm:$0xff] (!%p137_p2), %vm171_vm1, %v1339_v0  ;;  %1185 = vmatprep.mubr.msk.bf16.mxu0 (!%p137_p2), %vm1342_vm3, %v1340_v1  ;;  %1203 = vmatprep.mubr.msk.bf16.mxu1 (!%p137_p2), %vm1342_vm3, %v1340_v1  ;;  %v1317_v8 = vld [vmem:[%s1579_s1] sm:$0xff] (!%p137_p2)   ;;  %vm194_vm5 = vcmask (!%p137_p2), 130048   ;;  %s1344_s22 = smov (!%p137_p2), 126   ;;  %vm256_vm6 = vcmask (!%p137_p2), 1039360   ;;  %v1318_v12 = vld [vmem:[%s1579_s1 + $0x8] sm:$0xff] (!%p137_p2)  }
   0x8   : > { %vm316_vm7 = vcmask (!%p137_p2), 1031168   ;;  %v1319_v16 = vld [vmem:[%s1579_s1 + $0x10] sm:$0xff] (!%p137_p2)   ;;  %v184_v18 = vld [vmem:[%s1580_s2] sm:$0xff] (!%p137_p2)  ;;  %v185_v20 = vld [vmem:[%s1580_s2 + $0x8] sm:$0xff] (!%p137_p2) }
   0x9   : > { %v1320_v17 = vld [vmem:[%s1579_s1 + $0x30] sm:$0xff] (!%p137_p2)   ;;  %v1321_v32 = vld [vmem:[%s1579_s1 + $0x18] sm:$0xff] (!%p137_p2)   ;;  %v1322_v36 = vld [vmem:[%s1579_s1 + $0x20] sm:$0xff] (!%p137_p2)  }
   0xa   : > { %v1323_v40 = vld [vmem:[%s1579_s1 + $0x28] sm:$0xff] (!%p137_p2)   ;;  %v367_v41 = vld [vmem:[%s1580_s2 + $0x20] sm:$0xff] (!%p137_p2)  ;;  %v429_v42 = vld [vmem:[%s1580_s2 + $0x10] sm:$0xff] (!%p137_p2) }
   0xb   : > { %v368_v43 = vld [vmem:[%s1580_s2 + $0x28] sm:$0xff] (!%p137_p2)  ;;  %v430_v44 = vld [vmem:[%s1580_s2 + $0x18] sm:$0xff] (!%p137_p2)  ;;  %v1269_v45 = vadd.f32 (!%p137_p2), %v429_v42, %v367_v41  ;;  %v1325_v63 = vld [vmem:[%s1579_s1 + $0x40] sm:$0xff] (!%p137_p2)  }
   0xc   : > { %v1271_v46 = vadd.f32 (!%p137_p2), %v430_v44, %v368_v43  ;;  %v1324_v59 = vld [vmem:[%s1579_s1 + $0x38] sm:$0xff] (!%p137_p2)  }
   0xd   : > { %s1583_s13 = smov (!%p159_p3, %s1116_s13), 1 }
   0xe   : > { %s1121_s14 = sshll.u32 %s1583_s13, 2 }
   0xf   : > { %s162_s17 = scalar_lea.vmem %s1578_s0, %s1121_s14 }
  0x10   : > { %v173_v2 = vld [vmem:[%s162_s17] sm:$0xf] }
  0x11   : > { %v175_v3 = vsel %vm174_vm2, %v173_v2, 0.0 }
  0x12   : > { %v176_v4 = vpack.c.bf16 %v1340_v1, %v175_v3 }
  0x14   : > { %178 = vrot.lane.b32.xlu0 %v176_v4, %s1341_s18  ;;  %v1326_v4 = vld [vmem:[%s1579_s1 + $0x48] sm:$0xff]  }
  0x86   : > { %v179_v5 = vpop.permute.xlu0 %178 }
  0x87   : > { %182 = vst.msk [vmem:[#allocation2] sm:$0xff] %vm181_vm4, %v179_v5 }
  0x88   : > { %183 = vst.msk [vmem:[#allocation2 + $0x8] sm:$0xff] %vm169_vm0, %v179_v5  ;;  %v618_v5 = vld [vmem:[%s1580_s2 + $0x30] sm:$0xff] }
  0x8e   : > { %v243_v7 = vld [vmem:[#allocation2] sm:$0xff] }
  0x8f   : > { %v244_v6 = vld [vmem:[#allocation2 + $0x8] sm:$0xff]  ;;  %252 = vrot.lane.b32.xlu0 %v243_v7, %s1343_s19  ;;  %1184 = vmatpush3.bf16.msra.mxu0 %v243_v7 }
  0x90   : > { %254 = vrot.lane.b32.xlu1 %v244_v6, %s1343_s19  ;;  %1189 = vmatprep.subr.bf16.mxu0 %v1340_v1 }
  0x92   : > { %1186 = vmatmul.mubr.msk.bf16.vlgmr.msra.gmra.mrb[0].mxu0 %vm194_vm5, %v1317_v8 }
  0x93   : > { %314 = vrot.lane.b32.xlu0 %v244_v6, %s1344_s22  ;;  %1191 = vmatprep.mubr.msk.bf16.mxu0 %vm1342_vm3, %v1340_v1 }
  0x94   : > { %312 = vrot.lane.b32.xlu1 %v243_v7, %s1344_s22  ;;  %v619_v7 = vld [vmem:[%s1580_s2 + $0x38] sm:$0xff] }
 0x101   : > { %v253_v10 = vpop.permute.xlu0 %252 }
 0x102   : > { %v255_v9 = vpop.permute.xlu1 %254 }
 0x103   : > { %v257_v11 = vsel %vm256_vm6, %v253_v10, %v255_v9 }
 0x104   : > { %1190 = vmatpush3.bf16.msra.mxu0 %v257_v11  ;;  %1202 = vmatpush3.bf16.msra.mxu1 %v257_v11 }
 0x105   : > { %1195 = vmatprep.subr.bf16.mxu0 %v1340_v1  ;;  %1207 = vmatprep.subr.bf16.mxu1 %v1340_v1  ;;  %v315_v14 = vpop.permute.xlu0 %314 }
 0x106   : > { %v313_v13 = vpop.permute.xlu1 %312 }
 0x107   : > { %v317_v15 = vsel %vm316_vm7, %v313_v13, %v315_v14  ;;  %1192 = vmatmul.mubr.msk.bf16.vlgmr.msra.gmra.mrb[0].mxu0 %vm194_vm5, %v1318_v12  ;;  %1204 = vmatmul.mubr.msk.bf16.vlgmr.msra.gmra.mrb[0].mxu1 %vm194_vm5, %v1320_v17 }
 0x108   : > { %1196 = vmatpush3.bf16.msra.mxu0 %v317_v15  ;;  %1197 = vmatprep.mubr.msk.bf16.mxu0 %vm1342_vm3, %v1340_v1 }
 0x109   : > { %1225 = vmatprep.subr.bf16.mxu0 %v1340_v1  ;;  %1209 = vmatprep.mubr.msk.bf16.mxu1 %vm1342_vm3, %v1340_v1 }
 0x113   : > { %1198 = vmatmul.mubr.msk.bf16.vlgmr.msra.gmra.mrb[0].mxu0 %vm194_vm5, %v1319_v16 }
 0x114   : > { %1227 = vmatprep.mubr.msk.bf16.mxu0 %vm1342_vm3, %v1340_v1 }
 0x1e6   : > { %v356_v19 = vpop.f32.mrb[0].mxu0 }
 0x1e7   : > { %v1267_v21 = vadd.f32 %v356_v19, %v184_v18  ;;  %v1199_v22 = vpop.f32.mrb[1].mxu0  ;;  %v1327_v19 = vld [vmem:[%s1579_s1 + $0x50] sm:$0xff]  }
 0x1e8   : > { %v359_v23 = vpop.f32.mrb[2].mxu0 }
 0x1e9   : > { %v1268_v24 = vadd.f32 %v359_v23, %v185_v20  ;;  %v1200_v25 = vpop.f32.mrb[3].mxu0  ;;  %v365_v26 = vmax.f32 %v1267_v21, 0.0  ;;  %v1328_v23 = vld [vmem:[%s1579_s1 + $0x58] sm:$0xff]  }
 0x1eb   : > { %v366_v27 = vmax.f32 %v1268_v24, 0.0 }
 0x1ed   : > { %v422_v28 = vpack.c.bf16 %v366_v27, %v365_v26  ;;  %v1329_v27 = vld [vmem:[%s1579_s1 + $0x60] sm:$0xff]  }
 0x1ef   : > { %424 = vrot.lane.b32.xlu1 %v422_v28, %s1341_s18 }
 0x261   : > { %v425_v29 = vpop.permute.xlu1 %424 }
 0x262   : > { %427 = vst.msk [vmem:[#allocation2] sm:$0xff] %vm181_vm4, %v425_v29 }
 0x263   : > { %428 = vst.msk [vmem:[#allocation2 + $0x8] sm:$0xff] %vm169_vm0, %v425_v29 }
 0x269   : > { %v487_v31 = vld [vmem:[#allocation2] sm:$0xff] }
 0x26a   : > { %v488_v30 = vld [vmem:[#allocation2 + $0x8] sm:$0xff]  ;;  %496 = vrot.lane.b32.xlu0 %v487_v31, %s1343_s19  ;;  %1208 = vmatpush3.bf16.msra.mxu1 %v487_v31 }
 0x26b   : > { %498 = vrot.lane.b32.xlu1 %v488_v30, %s1343_s19  ;;  %1213 = vmatprep.subr.bf16.mxu1 %v1340_v1 }
 0x26d   : > { %1210 = vmatmul.mubr.msk.bf16.vlgmr.msra.gmra.mrb[0].mxu1 %vm194_vm5, %v1321_v32  ;;  %v805_v32 = vld [vmem:[%s1580_s2 + $0x40] sm:$0xff] }
 0x26e   : > { %555 = vrot.lane.b32.xlu0 %v487_v31, %s1344_s22  ;;  %1215 = vmatprep.mubr.msk.bf16.mxu1 %vm1342_vm3, %v1340_v1 }
 0x26f   : > { %557 = vrot.lane.b32.xlu1 %v488_v30, %s1344_s22 }
 0x2dc   : > { %v497_v34 = vpop.permute.xlu0 %496 }
 0x2dd   : > { %v499_v33 = vpop.permute.xlu1 %498 }
 0x2de   : > { %v500_v35 = vsel %vm256_vm6, %v497_v34, %v499_v33  ;;  %v806_v33 = vld [vmem:[%s1580_s2 + $0x48] sm:$0xff] }
 0x2df   : > { %1214 = vmatpush3.bf16.msra.mxu1 %v500_v35 }
 0x2e0   : > { %1219 = vmatprep.subr.bf16.mxu1 %v1340_v1  ;;  %v556_v38 = vpop.permute.xlu0 %555 }
 0x2e1   : > { %v558_v37 = vpop.permute.xlu1 %557 }
 0x2e2   : > { %v559_v39 = vsel %vm316_vm7, %v556_v38, %v558_v37  ;;  %1216 = vmatmul.mubr.msk.bf16.vlgmr.msra.gmra.mrb[0].mxu1 %vm194_vm5, %v1322_v36 }
 0x2e3   : > { %1220 = vmatpush3.bf16.msra.mxu1 %v559_v39  ;;  %1221 = vmatprep.mubr.msk.bf16.mxu1 %vm1342_vm3, %v1340_v1 }
 0x2e4   : > { %1243 = vmatprep.subr.bf16.mxu1 %v1340_v1 }
 0x2ee   : > { %1222 = vmatmul.mubr.msk.bf16.vlgmr.msra.gmra.mrb[0].mxu1 %vm194_vm5, %v1323_v40 }
 0x2ef   : > { %1245 = vmatprep.mubr.msk.bf16.mxu1 %vm1342_vm3, %v1340_v1 }
 0x3c1   : > { %v598_v47 = vpop.f32.mrb[0].mxu1 }
 0x3c2   : > { %v1472_v48 = vadd.f32 %v1269_v45, %v598_v47  ;;  %v1223_v49 = vpop.f32.mrb[1].mxu1 }
 0x3c3   : > { %v601_v50 = vpop.f32.mrb[2].mxu1 }
 0x3c4   : > { %v1474_v51 = vadd.f32 %v1271_v46, %v601_v50  ;;  %v1224_v52 = vpop.f32.mrb[3].mxu1  ;;  %v609_v53 = vmax.f32 %v1472_v48, 0.0 }
 0x3c6   : > { %v610_v54 = vmax.f32 %v1474_v51, 0.0 }
 0x3c8   : > { %v611_v55 = vpack.c.bf16 %v610_v54, %v609_v53 }
 0x3ca   : > { %613 = vrot.lane.b32.xlu0 %v611_v55, %s1341_s18 }
 0x43c   : > { %v614_v56 = vpop.permute.xlu0 %613 }
 0x43d   : > { %616 = vst.msk [vmem:[#allocation2] sm:$0xff] %vm181_vm4, %v614_v56 }
 0x43e   : > { %617 = vst.msk [vmem:[#allocation2 + $0x8] sm:$0xff] %vm169_vm0, %v614_v56 }
 0x444   : > { %v676_v58 = vld [vmem:[#allocation2] sm:$0xff] }
 0x445   : > { %v677_v57 = vld [vmem:[#allocation2 + $0x8] sm:$0xff]  ;;  %685 = vrot.lane.b32.xlu1 %v676_v58, %s1343_s19  ;;  %1226 = vmatpush3.bf16.msra.mxu0 %v676_v58 }
 0x446   : > { %687 = vrot.lane.b32.xlu0 %v677_v57, %s1343_s19  ;;  %1231 = vmatprep.subr.bf16.mxu0 %v1340_v1 }
 0x448   : > { %1228 = vmatmul.mubr.msk.bf16.vlgmr.msra.gmra.mrb[4].mxu0 %vm194_vm5, %v1324_v59  ;;  %v994_v59 = vld [vmem:[%s1580_s2 + $0x50] sm:$0xff] }
 0x449   : > { %744 = vrot.lane.b32.xlu1 %v676_v58, %s1344_s22  ;;  %1233 = vmatprep.mubr.msk.bf16.mxu0 %vm1342_vm3, %v1340_v1 }
 0x44a   : > { %746 = vrot.lane.b32.xlu0 %v677_v57, %s1344_s22 }
 0x4b7   : > { %v686_v61 = vpop.permute.xlu1 %685 }
 0x4b8   : > { %v688_v60 = vpop.permute.xlu0 %687 }
 0x4b9   : > { %v689_v62 = vsel %vm256_vm6, %v686_v61, %v688_v60  ;;  %v995_v61 = vld [vmem:[%s1580_s2 + $0x58] sm:$0xff] }
 0x4ba   : > { %1232 = vmatpush3.bf16.msra.mxu0 %v689_v62 }
 0x4bb   : > { %1237 = vmatprep.subr.bf16.mxu0 %v1340_v1  ;;  %v745_v2 = vpop.permute.xlu1 %744 }
 0x4bc   : > { %v747_v0 = vpop.permute.xlu0 %746 }
 0x4bd   : > { %v748_v3 = vsel %vm316_vm7, %v745_v2, %v747_v0  ;;  %1234 = vmatmul.mubr.msk.bf16.vlgmr.msra.gmra.mrb[4].mxu0 %vm194_vm5, %v1325_v63 }
 0x4be   : > { %1238 = vmatpush3.bf16.msra.mxu0 %v748_v3  ;;  %1239 = vmatprep.mubr.msk.bf16.mxu0 %vm1342_vm3, %v1340_v1 }
 0x4bf   : > { %1255 = vmatprep.subr.bf16.mxu0 %v1340_v1 }
 0x4c9   : > { %1240 = vmatmul.mubr.msk.bf16.vlgmr.msra.gmra.mrb[4].mxu0 %vm194_vm5, %v1326_v4 }
 0x4ca   : > { %1257 = vmatprep.mubr.msk.bf16.mxu0 %vm1342_vm3, %v1340_v1 }
 0x59c   : > { %v787_v6 = vpop.f32.mrb[4].mxu0 }
 0x59d   : > { %v1273_v8 = vadd.f32 %v787_v6, %v618_v5  ;;  %v1241_v9 = vpop.f32.mrb[5].mxu0 }
 0x59e   : > { %v790_v10 = vpop.f32.mrb[6].mxu0 }
 0x59f   : > { %v1274_v11 = vadd.f32 %v790_v10, %v619_v7  ;;  %v1242_v12 = vpop.f32.mrb[7].mxu0  ;;  %v796_v13 = vmax.f32 %v1273_v8, 0.0 }
 0x5a1   : > { %v797_v14 = vmax.f32 %v1274_v11, 0.0 }
 0x5a3   : > { %v798_v15 = vpack.c.bf16 %v797_v14, %v796_v13 }
 0x5a5   : > { %800 = vrot.lane.b32.xlu1 %v798_v15, %s1341_s18 }
 0x617   : > { %v801_v16 = vpop.permute.xlu1 %800 }
 0x618   : > { %803 = vst.msk [vmem:[#allocation2] sm:$0xff] %vm181_vm4, %v801_v16 }
 0x619   : > { %804 = vst.msk [vmem:[#allocation2 + $0x8] sm:$0xff] %vm169_vm0, %v801_v16 }
 0x61f   : > { %v863_v18 = vld [vmem:[#allocation2] sm:$0xff] }
 0x620   : > { %v864_v17 = vld [vmem:[#allocation2 + $0x8] sm:$0xff]  ;;  %872 = vrot.lane.b32.xlu0 %v863_v18, %s1343_s19  ;;  %1244 = vmatpush3.bf16.msra.mxu1 %v863_v18 }
 0x621   : > { %874 = vrot.lane.b32.xlu1 %v864_v17, %s1343_s19  ;;  %1249 = vmatprep.subr.bf16.mxu1 %v1340_v1 }
 0x623   : > { %1246 = vmatmul.mubr.msk.bf16.vlgmr.msra.gmra.mrb[4].mxu1 %vm194_vm5, %v1327_v19 }
 0x624   : > { %931 = vrot.lane.b32.xlu0 %v863_v18, %s1344_s22  ;;  %1251 = vmatprep.mubr.msk.bf16.mxu1 %vm1342_vm3, %v1340_v1 }
 0x625   : > { %933 = vrot.lane.b32.xlu1 %v864_v17, %s1344_s22 }
 0x692   : > { %v873_v21 = vpop.permute.xlu0 %872 }
 0x693   : > { %v875_v20 = vpop.permute.xlu1 %874 }
 0x694   : > { %v876_v22 = vsel %vm256_vm6, %v873_v21, %v875_v20 }
 0x695   : > { %1250 = vmatpush3.bf16.msra.mxu1 %v876_v22 }
 0x696   : > { %1261 = vmatprep.subr.bf16.mxu1 %v1340_v1  ;;  %v932_v25 = vpop.permute.xlu0 %931 }
 0x697   : > { %v934_v24 = vpop.permute.xlu1 %933 }
 0x698   : > { %v935_v26 = vsel %vm316_vm7, %v932_v25, %v934_v24  ;;  %1252 = vmatmul.mubr.msk.bf16.vlgmr.msra.gmra.mrb[8].mxu1 %vm194_vm5, %v1328_v23 }
 0x699   : > { %1256 = vmatpush3.bf16.msra.mxu0 %v935_v26  ;;  %1263 = vmatprep.mubr.msk.bf16.mxu1 %vm1342_vm3, %v1340_v1 }
 0x69c   : > { %1258 = vmatmul.mubr.msk.bf16.vlgmr.msra.gmra.mrb[8].mxu0 %vm194_vm5, %v1329_v27 }
 0x6f6   : > { %v852_v28 = vpop.f32.mrb[4].mxu1 }
 0x6f7   : > { %v1247_v29 = vpop.f32.mrb[5].mxu1  ;;  %v859_v34 = vadd.f32 %v852_v28, %v805_v32 }
 0x6f8   : > { %v855_v30 = vpop.f32.mrb[6].mxu1 }
 0x6f9   : > { %v1248_v31 = vpop.f32.mrb[7].mxu1  ;;  %v860_v36 = vadd.f32 %v855_v30, %v806_v33 }
 0x76b   : > { %v915_v35 = vpop.f32.mrb[8].mxu1 }
 0x76c   : > { %v922_v37 = vadd.f32 %v915_v35, %v859_v34  ;;  %v1253_v38 = vpop.f32.mrb[9].mxu1 }
 0x76d   : > { %v918_v1 = vpop.f32.mrb[10].mxu1 }
 0x76e   : > { %v923_v39 = vadd.f32 %v918_v1, %v860_v36  ;;  %v1254_v40 = vpop.f32.mrb[11].mxu1 }
 0x76f   : > { %v974_v41 = vpop.f32.mrb[8].mxu0 }
 0x770   : > { %v981_v42 = vadd.f32 %v974_v41, %v922_v37  ;;  %v1259_v43 = vpop.f32.mrb[9].mxu0 }
 0x771   : > { %v977_v44 = vpop.f32.mrb[10].mxu0 }
 0x772   : > { %v983_v45 = vadd.f32 %v981_v42, %v609_v53  ;;  %v982_v46 = vadd.f32 %v977_v44, %v923_v39  ;;  %v1260_v47 = vpop.f32.mrb[11].mxu0 }
 0x774   : > { %v984_v49 = vadd.f32 %v982_v46, %v610_v54  ;;  %v985_v50 = vmax.f32 %v983_v45, 0.0  ;;  %v1330_v54 = vld [vmem:[%s1579_s1 + $0x68] sm:$0xff]  }
 0x776   : > { %v986_v52 = vmax.f32 %v984_v49, 0.0 }
 0x778   : > { %v987_v55 = vpack.c.bf16 %v986_v52, %v985_v50 }
 0x77a   : > { %989 = vrot.lane.b32.xlu0 %v987_v55, %s1341_s18  ;;  %s1154_s18 = sshll.u32 %s1583_s13, 4 }
 0x7ec   : > { %v990_v56 = vpop.permute.xlu0 %989 }
 0x7ed   : > { %992 = vst.msk [vmem:[#allocation2] sm:$0xff] %vm181_vm4, %v990_v56 }
 0x7ee   : > { %993 = vst.msk [vmem:[#allocation2 + $0x8] sm:$0xff] %vm169_vm0, %v990_v56 }
 0x7f4   : > { %v998_v58 = vld [vmem:[#allocation2] sm:$0xff] }
 0x7f5   : > { %v999_v57 = vld [vmem:[#allocation2 + $0x8] sm:$0xff]  ;;  %1007 = vrot.lane.b32.xlu1 %v998_v58, %s1343_s19 }
 0x7f6   : > { %1009 = vrot.lane.b32.xlu0 %v999_v57, %s1343_s19  ;;  %s167_s19 = scalar_lea.vmem %s1581_s3, %s1154_s18 }
 0x867   : > { %v1008_v51 = vpop.permute.xlu1 %1007 }
 0x868   : > { %v1010_v48 = vpop.permute.xlu0 %1009 }
 0x869   : > { %v1011_v53 = vsel %vm256_vm6, %v1008_v51, %v1010_v48 }
 0x86a   : > { %1262 = vmatpush3.bf16.msra.mxu1 %v1011_v53 }
 0x86d   : > { %1264 = vmatmul.mubr.msk.bf16.vlgmr.msra.gmra.mrb[12].mxu1 %vm194_vm5, %v1330_v54 }
 0x940   : > { %v1050_v60 = vpop.f32.mrb[12].mxu1 }
 0x941   : > { %v1057_v62 = vadd.f32 %v1050_v60, %v994_v59  ;;  %v1265_v63 = vpop.f32.mrb[13].mxu1 }
 0x942   : > { %v1053_v0 = vpop.f32.mrb[14].mxu1 }
 0x943   : > { %1059 = vst [vmem:[%s167_s19] sm:$0xff] %v1057_v62  ;;  %v1058_v2 = vadd.f32 %v1053_v0, %v995_v61  ;;  %v1266_v3 = vpop.f32.mrb[15].mxu1 }
 0x945   : > { %1060 = vst [vmem:[%s167_s19 + $0x8] sm:$0xff] %v1058_v2 }
 0x946 PF: > { %s13_s12 = sadd.s32 1, %s1337_s12  }
 0x947   : > { %p10_p4 = scmp.ge.s32.totalorder %s13_s12, 4  }
 0x949   :  { %12 = sbr.rel (!%p10_p4) target bundleno = 1 (0x1), region = 62 }

</bundles_post_ra>
